<compile_context>
chip_gen: v7x
topology: tpu7x:2x2x1
jax: 0.10.0
libtpu: 0.0.40
codegen_flags: <defaults>
</compile_context>

<pallas_src>
import jax
import jax.numpy as jnp
from jax.experimental import pallas as pl
from jax.experimental.pallas import tpu as pltpu


def _round_up(x: int, m: int) -> int:
    return (x + m - 1) // m * m


def skipgram_forward(center_tbl, context_tbl, center, context, neg_context,
                     *, max_tile_rows: int = 1024,
                     vmem_budget_bytes: int = 8 * 1024 * 1024):
    """Matches SkipGram.forward: returns the scalar mean loss."""
    V, D = center_tbl.shape
    B = int(center.shape[0])
    K = int(neg_context.shape[1])
    itemsize = jnp.dtype(center_tbl.dtype).itemsize

    # --- choose the batch tile (TB): largest multiple of 8 whose gather working
    # set fits a conservative VMEM budget (safe on v7x's 64 MiB as well).
    lane_d = max(D, 128)                       # VMEM scratch pads lanes to 128
    row_bytes = (2 + K) * lane_d * itemsize    # center + context + K negatives
    tb = vmem_budget_bytes // row_bytes
    tb = int(max(8, min(tb, max_tile_rows, 1024)))
    tb = (tb // 8) * 8
    tb = min(tb, _round_up(B, 8))
    b_pad = _round_up(B, tb)
    num_tiles = b_pad // tb
    pad_b = b_pad - B

    # --- index arrays (scalar prefetch -> SMEM).  Negatives are laid out as
    # (K, B_pad) flattened so that, per tile, the rows for a fixed negative slot
    # k are contiguous in the gather buffer (sublane-dense, no K padding).
    center_idx = jnp.pad(center.astype(jnp.int32), (0, pad_b))
    context_idx = jnp.pad(context.astype(jnp.int32), (0, pad_b))
    neg_idx = jnp.pad(neg_context.astype(jnp.int32).T,
                      ((0, 0), (0, pad_b))).reshape(-1)        # (K * B_pad,)

    def kernel(center_idx_ref, context_idx_ref, neg_idx_ref,    # SMEM (prefetch)
               center_tbl_ref, context_tbl_ref,                 # HBM (pl.ANY)
               out_ref,                                         # (1, 8, 128) VMEM
               ec_buf, ex_buf, en_buf, sem):                    # scratch
        t = pl.program_id(0)
        base = t * tb

        # ---- gather: one row DMA per embedding lookup, all issued, then drained.
        def issue(j, carry):
            row = base + j
            pltpu.make_async_copy(
                center_tbl_ref.at[pl.ds(center_idx_ref[row], 1)],
                ec_buf.at[pl.ds(j, 1)], sem).start()
            pltpu.make_async_copy(
                context_tbl_ref.at[pl.ds(context_idx_ref[row], 1)],
                ex_buf.at[pl.ds(j, 1)], sem).start()
            for k in range(K):                                   # static unroll
                pltpu.make_async_copy(
                    context_tbl_ref.at[pl.ds(neg_idx_ref[k * b_pad + row], 1)],
                    en_buf.at[pl.ds(k * tb + j, 1)], sem).start()
            return carry

        jax.lax.fori_loop(0, tb, issue, 0)

        # All row copies have identical size, so a counted wait on one shared
        # DMA semaphore drains every outstanding transfer.
        def drain(i, carry):
            pltpu.make_async_copy(
                center_tbl_ref.at[pl.ds(0, 1)],
                ec_buf.at[pl.ds(0, 1)], sem).wait()
            return carry

        jax.lax.fori_loop(0, tb * (2 + K), drain, 0)

        # ---- compute (VPU multiply + XLU lane reduce; MXU intentionally unused).
        ec = ec_buf[...].astype(jnp.float32)                     # (TB, D)
        ex = ex_buf[...].astype(jnp.float32)                     # (TB, D)

        score = jnp.sum(ec * ex, axis=-1, keepdims=True)         # (TB, 1)
        score = jnp.clip(score, -10.0, 10.0)
        loss = jnp.log1p(jnp.exp(-score))                        # -logsigmoid(score)

        for k in range(K):                                       # static slices
            en_k = en_buf[k * tb:(k + 1) * tb, :].astype(jnp.float32)  # (TB, D)
            nk = jnp.sum(en_k * ec, axis=-1, keepdims=True)      # (TB, 1)
            nk = jnp.clip(nk, -10.0, 10.0)
            loss = loss + jnp.log1p(jnp.exp(nk))                 # -logsigmoid(-nk)

        # Mask rows that only exist because of batch padding, emit per-tile sum.
        rows = base + jax.lax.broadcasted_iota(jnp.int32, (tb, 1), 0)
        tile_sum = jnp.sum(jnp.where(rows < B, loss, 0.0))
        out_ref[...] = jnp.full(out_ref.shape, tile_sum, dtype=jnp.float32)

    partials = pl.pallas_call(
        kernel,
        out_shape=jax.ShapeDtypeStruct((num_tiles, 8, 128), jnp.float32),
        grid_spec=pltpu.PrefetchScalarGridSpec(
            num_scalar_prefetch=3,
            grid=(num_tiles,),
            in_specs=[
                pl.BlockSpec(memory_space=pl.ANY),   # center table stays in HBM
                pl.BlockSpec(memory_space=pl.ANY),   # context table stays in HBM
            ],
            out_specs=pl.BlockSpec((1, 8, 128), lambda t, *_: (t, 0, 0)),
            scratch_shapes=[
                pltpu.VMEM((tb, D), center_tbl.dtype),        # gathered centers
                pltpu.VMEM((tb, D), context_tbl.dtype),       # gathered contexts
                pltpu.VMEM((tb * K, D), context_tbl.dtype),   # gathered negatives
                pltpu.SemaphoreType.DMA,
            ],
        ),
        compiler_params=pltpu.CompilerParams(
            dimension_semantics=("parallel",),
        ),
    )(center_idx, context_idx, neg_idx, center_tbl, context_tbl)

    # Final mean over the TRUE batch size, done once in JAX over tile partials.
    return jnp.sum(partials[:, 0, 0]) / jnp.float32(B)


def skipgram_reference(center_tbl, context_tbl, center, context, neg_context):
    """Pure-JAX reference mirroring the PyTorch forward exactly."""
    ec = center_tbl[center]
    ex = context_tbl[context]
    en = context_tbl[neg_context]
    score = jnp.sum(ec * ex, axis=1)
    score = jnp.clip(score, -10.0, 10.0)
    pos = -jax.nn.log_sigmoid(score)
    neg = jnp.einsum("bkd,bd->bk", en, ec)
    neg = jnp.clip(neg, -10.0, 10.0)
    neg = -jnp.sum(jax.nn.log_sigmoid(-neg), axis=1)
    return jnp.mean(pos + neg)


if __name__ == "__main__":
    # Small, deterministic shapes consistent with the module.
    emb_size = 64     # vocabulary size
    emb_dim = 32      # embedding dim
    B = 13            # deliberately not a multiple of 8: exercises padding/masking
    K = 5             # negatives per pair

    key = jax.random.PRNGKey(0)
    k_center, k_ctx, k_c, k_x, k_n = jax.random.split(key, 5)

    emb_range = 0.5 / emb_dim
    center_tbl = jax.random.uniform(
        k_center, (emb_size, emb_dim), jnp.float32,
        minval=-emb_range, maxval=emb_range)
    # init_emb() would zero the context table; use small random values here so
    # the in-kernel gathers of context/negative rows are actually exercised.
    context_tbl = jax.random.uniform(
        k_ctx, (emb_size, emb_dim), jnp.float32,
        minval=-emb_range, maxval=emb_range)

    center = jax.random.randint(k_c, (B,), 0, emb_size, dtype=jnp.int32)
    context = jax.random.randint(k_x, (B,), 0, emb_size, dtype=jnp.int32)
    neg_context = jax.random.randint(k_n, (B, K), 0, emb_size, dtype=jnp.int32)

    # max_tile_rows=8 forces a 2-tile grid with a padded last tile (TB=8, B=13).
    loss = skipgram_forward(center_tbl, context_tbl, center, context, neg_context,
                            max_tile_rows=8)
    loss = jax.block_until_ready(loss)

    ref = skipgram_reference(center_tbl, context_tbl, center, context, neg_context)
    ref = jax.block_until_ready(ref)

    assert jnp.isfinite(loss), "kernel produced non-finite loss"
    assert jnp.allclose(loss, ref, rtol=1e-5, atol=1e-5), (loss, ref)

    print("KERNEL_OK")
</pallas_src>

<mosaic_0001>
module attributes {stable_mosaic.version = 11 : i64} {
  func.func @kernel(%arg0: i32, %arg1: memref<16xi32, #tpu.memory_space<smem>>, %arg2: memref<16xi32, #tpu.memory_space<smem>>, %arg3: memref<80xi32, #tpu.memory_space<smem>>, %arg4: memref<64x32xf32, #tpu.memory_space<any>>, %arg5: memref<64x32xf32, #tpu.memory_space<any>>, %arg6: memref<1x8x128xf32, #tpu.memory_space<vmem>>, %arg7: memref<8x32xf32, #tpu.memory_space<vmem>>, %arg8: memref<8x32xf32, #tpu.memory_space<vmem>>, %arg9: memref<40x32xf32, #tpu.memory_space<vmem>>, %arg10: memref<!tpu.dma_semaphore, #tpu.memory_space<semaphore_mem>>) attributes {dimension_semantics = [#tpu.dimension_semantics<parallel>], iteration_bounds = array<i64: 2>, scalar_prefetch = 3 : i64, scratch_operands = 4 : i64, tpu.core_type = #tpu.core_type<tc>, window_params = [{}, {}, {transform_indices = @transform_2, window_bounds = array<i64: 1, 8, 128>}]} {
    %c8_i32 = arith.constant 8 : i32
    %0 = arith.muli %arg0, %c8_i32 : i32
    %c0_i32 = arith.constant 0 : i32
    %c8_i32_0 = arith.constant 8 : i32
    %1 = arith.addi %c0_i32, %c8_i32_0 : i32
    %c1_i32 = arith.constant 1 : i32
    scf.for %arg11 = %c0_i32 to %1 step %c1_i32  : i32 {
      %84 = arith.addi %0, %arg11 : i32
      %85 = arith.index_cast %84 : i32 to index
      %86 = memref.load %arg1[%85] : memref<16xi32, #tpu.memory_space<smem>>
      %c0_i32_36 = arith.constant 0 : i32
      %87 = tpu.memref_slice %arg4[%86, %c0_i32_36] : memref<64x32xf32, #tpu.memory_space<any>> -> memref<1x32xf32, #tpu.memory_space<any>>
      %c0_i32_37 = arith.constant 0 : i32
      %88 = tpu.memref_slice %arg7[%arg11, %c0_i32_37] : memref<8x32xf32, #tpu.memory_space<vmem>> -> memref<1x32xf32, #tpu.memory_space<vmem>>
      tpu.enqueue_dma source(%87 : memref<1x32xf32, #tpu.memory_space<any>>) target(%88 : memref<1x32xf32, #tpu.memory_space<vmem>>) target_semaphore(%arg10 : memref<!tpu.dma_semaphore, #tpu.memory_space<semaphore_mem>>)
      %89 = arith.index_cast %84 : i32 to index
      %90 = memref.load %arg2[%89] : memref<16xi32, #tpu.memory_space<smem>>
      %c0_i32_38 = arith.constant 0 : i32
      %91 = tpu.memref_slice %arg5[%90, %c0_i32_38] : memref<64x32xf32, #tpu.memory_space<any>> -> memref<1x32xf32, #tpu.memory_space<any>>
      %c0_i32_39 = arith.constant 0 : i32
      %92 = tpu.memref_slice %arg8[%arg11, %c0_i32_39] : memref<8x32xf32, #tpu.memory_space<vmem>> -> memref<1x32xf32, #tpu.memory_space<vmem>>
      tpu.enqueue_dma source(%91 : memref<1x32xf32, #tpu.memory_space<any>>) target(%92 : memref<1x32xf32, #tpu.memory_space<vmem>>) target_semaphore(%arg10 : memref<!tpu.dma_semaphore, #tpu.memory_space<semaphore_mem>>)
      %c0_i32_40 = arith.constant 0 : i32
      %93 = arith.addi %c0_i32_40, %84 : i32
      %94 = arith.index_cast %93 : i32 to index
      %95 = memref.load %arg3[%94] : memref<80xi32, #tpu.memory_space<smem>>
      %c0_i32_41 = arith.constant 0 : i32
      %96 = arith.addi %c0_i32_41, %arg11 : i32
      %c0_i32_42 = arith.constant 0 : i32
      %97 = tpu.memref_slice %arg5[%95, %c0_i32_42] : memref<64x32xf32, #tpu.memory_space<any>> -> memref<1x32xf32, #tpu.memory_space<any>>
      %c0_i32_43 = arith.constant 0 : i32
      %98 = tpu.memref_slice %arg9[%96, %c0_i32_43] : memref<40x32xf32, #tpu.memory_space<vmem>> -> memref<1x32xf32, #tpu.memory_space<vmem>>
      tpu.enqueue_dma source(%97 : memref<1x32xf32, #tpu.memory_space<any>>) target(%98 : memref<1x32xf32, #tpu.memory_space<vmem>>) target_semaphore(%arg10 : memref<!tpu.dma_semaphore, #tpu.memory_space<semaphore_mem>>)
      %c16_i32 = arith.constant 16 : i32
      %99 = arith.addi %c16_i32, %84 : i32
      %100 = arith.index_cast %99 : i32 to index
      %101 = memref.load %arg3[%100] : memref<80xi32, #tpu.memory_space<smem>>
      %c8_i32_44 = arith.constant 8 : i32
      %102 = arith.addi %c8_i32_44, %arg11 : i32
      %c0_i32_45 = arith.constant 0 : i32
      %103 = tpu.memref_slice %arg5[%101, %c0_i32_45] : memref<64x32xf32, #tpu.memory_space<any>> -> memref<1x32xf32, #tpu.memory_space<any>>
      %c0_i32_46 = arith.constant 0 : i32
      %104 = tpu.memref_slice %arg9[%102, %c0_i32_46] : memref<40x32xf32, #tpu.memory_space<vmem>> -> memref<1x32xf32, #tpu.memory_space<vmem>>
      tpu.enqueue_dma source(%103 : memref<1x32xf32, #tpu.memory_space<any>>) target(%104 : memref<1x32xf32, #tpu.memory_space<vmem>>) target_semaphore(%arg10 : memref<!tpu.dma_semaphore, #tpu.memory_space<semaphore_mem>>)
      %c32_i32 = arith.constant 32 : i32
      %105 = arith.addi %c32_i32, %84 : i32
      %106 = arith.index_cast %105 : i32 to index
      %107 = memref.load %arg3[%106] : memref<80xi32, #tpu.memory_space<smem>>
      %c16_i32_47 = arith.constant 16 : i32
      %108 = arith.addi %c16_i32_47, %arg11 : i32
      %c0_i32_48 = arith.constant 0 : i32
      %109 = tpu.memref_slice %arg5[%107, %c0_i32_48] : memref<64x32xf32, #tpu.memory_space<any>> -> memref<1x32xf32, #tpu.memory_space<any>>
      %c0_i32_49 = arith.constant 0 : i32
      %110 = tpu.memref_slice %arg9[%108, %c0_i32_49] : memref<40x32xf32, #tpu.memory_space<vmem>> -> memref<1x32xf32, #tpu.memory_space<vmem>>
      tpu.enqueue_dma source(%109 : memref<1x32xf32, #tpu.memory_space<any>>) target(%110 : memref<1x32xf32, #tpu.memory_space<vmem>>) target_semaphore(%arg10 : memref<!tpu.dma_semaphore, #tpu.memory_space<semaphore_mem>>)
      %c48_i32 = arith.constant 48 : i32
      %111 = arith.addi %c48_i32, %84 : i32
      %112 = arith.index_cast %111 : i32 to index
      %113 = memref.load %arg3[%112] : memref<80xi32, #tpu.memory_space<smem>>
      %c24_i32 = arith.constant 24 : i32
      %114 = arith.addi %c24_i32, %arg11 : i32
      %c0_i32_50 = arith.constant 0 : i32
      %115 = tpu.memref_slice %arg5[%113, %c0_i32_50] : memref<64x32xf32, #tpu.memory_space<any>> -> memref<1x32xf32, #tpu.memory_space<any>>
      %c0_i32_51 = arith.constant 0 : i32
      %116 = tpu.memref_slice %arg9[%114, %c0_i32_51] : memref<40x32xf32, #tpu.memory_space<vmem>> -> memref<1x32xf32, #tpu.memory_space<vmem>>
      tpu.enqueue_dma source(%115 : memref<1x32xf32, #tpu.memory_space<any>>) target(%116 : memref<1x32xf32, #tpu.memory_space<vmem>>) target_semaphore(%arg10 : memref<!tpu.dma_semaphore, #tpu.memory_space<semaphore_mem>>)
      %c64_i32 = arith.constant 64 : i32
      %117 = arith.addi %c64_i32, %84 : i32
      %118 = arith.index_cast %117 : i32 to index
      %119 = memref.load %arg3[%118] : memref<80xi32, #tpu.memory_space<smem>>
      %c32_i32_52 = arith.constant 32 : i32
      %120 = arith.addi %c32_i32_52, %arg11 : i32
      %c0_i32_53 = arith.constant 0 : i32
      %121 = tpu.memref_slice %arg5[%119, %c0_i32_53] : memref<64x32xf32, #tpu.memory_space<any>> -> memref<1x32xf32, #tpu.memory_space<any>>
      %c0_i32_54 = arith.constant 0 : i32
      %122 = tpu.memref_slice %arg9[%120, %c0_i32_54] : memref<40x32xf32, #tpu.memory_space<vmem>> -> memref<1x32xf32, #tpu.memory_space<vmem>>
      tpu.enqueue_dma source(%121 : memref<1x32xf32, #tpu.memory_space<any>>) target(%122 : memref<1x32xf32, #tpu.memory_space<vmem>>) target_semaphore(%arg10 : memref<!tpu.dma_semaphore, #tpu.memory_space<semaphore_mem>>)
    }
    %c8_i32_1 = arith.constant 8 : i32
    %c0_i32_2 = arith.constant 0 : i32
    %c56_i32 = arith.constant 56 : i32
    %2 = arith.addi %c0_i32_2, %c56_i32 : i32
    %c1_i32_3 = arith.constant 1 : i32
    scf.for %arg11 = %c0_i32_2 to %2 step %c1_i32_3  : i32 {
      %c0_i32_36 = arith.constant 0 : i32
      %c0_i32_37 = arith.constant 0 : i32
      %84 = tpu.memref_slice %arg4[%c0_i32_36, %c0_i32_37] : memref<64x32xf32, #tpu.memory_space<any>> -> memref<1x32xf32, #tpu.memory_space<any>>
      %c0_i32_38 = arith.constant 0 : i32
      %c0_i32_39 = arith.constant 0 : i32
      %85 = tpu.memref_slice %arg7[%c0_i32_38, %c0_i32_39] : memref<8x32xf32, #tpu.memory_space<vmem>> -> memref<1x32xf32, #tpu.memory_space<vmem>>
      tpu.wait_dma2 semaphore(%arg10 : memref<!tpu.dma_semaphore, #tpu.memory_space<semaphore_mem>>) src(%84 : memref<1x32xf32, #tpu.memory_space<any>>) dst(%85 : memref<1x32xf32, #tpu.memory_space<vmem>>)
    }
    %c0 = arith.constant 0 : index
    %c0_4 = arith.constant 0 : index
    %3 = vector.load %arg7[%c0, %c0_4] : memref<8x32xf32, #tpu.memory_space<vmem>>, vector<8x32xf32>
    %c0_5 = arith.constant 0 : index
    %c0_6 = arith.constant 0 : index
    %4 = vector.load %arg8[%c0_5, %c0_6] : memref<8x32xf32, #tpu.memory_space<vmem>>, vector<8x32xf32>
    %5 = arith.mulf %3, %4 : vector<8x32xf32>
    %cst = arith.constant dense<0.000000e+00> : vector<8xf32>
    %6 = vector.multi_reduction <add>, %5, %cst [1] : vector<8x32xf32> to vector<8xf32>
    %7 = vector.shape_cast %6 : vector<8xf32> to vector<8x1xf32>
    %cst_7 = arith.constant -1.000000e+01 : f32
    %cst_8 = arith.constant 1.000000e+01 : f32
    %8 = vector.broadcast %cst_7 : f32 to vector<8x1xf32>
    %9 = arith.maximumf %8, %7 : vector<8x1xf32>
    %10 = vector.broadcast %cst_8 : f32 to vector<8x1xf32>
    %11 = arith.minimumf %10, %9 : vector<8x1xf32>
    %cst_9 = arith.constant 0.000000e+00 : f32
    %12 = vector.broadcast %cst_9 : f32 to vector<8x1xf32>
    %13 = arith.subf %12, %11 : vector<8x1xf32>
    %14 = math.exp %13 : vector<8x1xf32>
    %15 = math.log1p %14 : vector<8x1xf32>
    %c0_10 = arith.constant 0 : index
    %c0_11 = arith.constant 0 : index
    %16 = vector.load %arg9[%c0_10, %c0_11] : memref<40x32xf32, #tpu.memory_space<vmem>>, vector<8x32xf32>
    %17 = arith.mulf %16, %3 : vector<8x32xf32>
    %cst_12 = arith.constant dense<0.000000e+00> : vector<8xf32>
    %18 = vector.multi_reduction <add>, %17, %cst_12 [1] : vector<8x32xf32> to vector<8xf32>
    %19 = vector.shape_cast %18 : vector<8xf32> to vector<8x1xf32>
    %cst_13 = arith.constant -1.000000e+01 : f32
    %cst_14 = arith.constant 1.000000e+01 : f32
    %20 = vector.broadcast %cst_13 : f32 to vector<8x1xf32>
    %21 = arith.maximumf %20, %19 : vector<8x1xf32>
    %22 = vector.broadcast %cst_14 : f32 to vector<8x1xf32>
    %23 = arith.minimumf %22, %21 : vector<8x1xf32>
    %24 = math.exp %23 : vector<8x1xf32>
    %25 = math.log1p %24 : vector<8x1xf32>
    %26 = arith.addf %15, %25 : vector<8x1xf32>
    %c8 = arith.constant 8 : index
    %c0_15 = arith.constant 0 : index
    %27 = vector.load %arg9[%c8, %c0_15] : memref<40x32xf32, #tpu.memory_space<vmem>>, vector<8x32xf32>
    %28 = arith.mulf %27, %3 : vector<8x32xf32>
    %cst_16 = arith.constant dense<0.000000e+00> : vector<8xf32>
    %29 = vector.multi_reduction <add>, %28, %cst_16 [1] : vector<8x32xf32> to vector<8xf32>
    %30 = vector.shape_cast %29 : vector<8xf32> to vector<8x1xf32>
    %cst_17 = arith.constant -1.000000e+01 : f32
    %cst_18 = arith.constant 1.000000e+01 : f32
    %31 = vector.broadcast %cst_17 : f32 to vector<8x1xf32>
    %32 = arith.maximumf %31, %30 : vector<8x1xf32>
    %33 = vector.broadcast %cst_18 : f32 to vector<8x1xf32>
    %34 = arith.minimumf %33, %32 : vector<8x1xf32>
    %35 = math.exp %34 : vector<8x1xf32>
    %36 = math.log1p %35 : vector<8x1xf32>
    %37 = arith.addf %26, %36 : vector<8x1xf32>
    %c16 = arith.constant 16 : index
    %c0_19 = arith.constant 0 : index
    %38 = vector.load %arg9[%c16, %c0_19] : memref<40x32xf32, #tpu.memory_space<vmem>>, vector<8x32xf32>
    %39 = arith.mulf %38, %3 : vector<8x32xf32>
    %cst_20 = arith.constant dense<0.000000e+00> : vector<8xf32>
    %40 = vector.multi_reduction <add>, %39, %cst_20 [1] : vector<8x32xf32> to vector<8xf32>
    %41 = vector.shape_cast %40 : vector<8xf32> to vector<8x1xf32>
    %cst_21 = arith.constant -1.000000e+01 : f32
    %cst_22 = arith.constant 1.000000e+01 : f32
    %42 = vector.broadcast %cst_21 : f32 to vector<8x1xf32>
    %43 = arith.maximumf %42, %41 : vector<8x1xf32>
    %44 = vector.broadcast %cst_22 : f32 to vector<8x1xf32>
    %45 = arith.minimumf %44, %43 : vector<8x1xf32>
    %46 = math.exp %45 : vector<8x1xf32>
    %47 = math.log1p %46 : vector<8x1xf32>
    %48 = arith.addf %37, %47 : vector<8x1xf32>
    %c24 = arith.constant 24 : index
    %c0_23 = arith.constant 0 : index
    %49 = vector.load %arg9[%c24, %c0_23] : memref<40x32xf32, #tpu.memory_space<vmem>>, vector<8x32xf32>
    %50 = arith.mulf %49, %3 : vector<8x32xf32>
    %cst_24 = arith.constant dense<0.000000e+00> : vector<8xf32>
    %51 = vector.multi_reduction <add>, %50, %cst_24 [1] : vector<8x32xf32> to vector<8xf32>
    %52 = vector.shape_cast %51 : vector<8xf32> to vector<8x1xf32>
    %cst_25 = arith.constant -1.000000e+01 : f32
    %cst_26 = arith.constant 1.000000e+01 : f32
    %53 = vector.broadcast %cst_25 : f32 to vector<8x1xf32>
    %54 = arith.maximumf %53, %52 : vector<8x1xf32>
    %55 = vector.broadcast %cst_26 : f32 to vector<8x1xf32>
    %56 = arith.minimumf %55, %54 : vector<8x1xf32>
    %57 = math.exp %56 : vector<8x1xf32>
    %58 = math.log1p %57 : vector<8x1xf32>
    %59 = arith.addf %48, %58 : vector<8x1xf32>
    %c32 = arith.constant 32 : index
    %c0_27 = arith.constant 0 : index
    %60 = vector.load %arg9[%c32, %c0_27] : memref<40x32xf32, #tpu.memory_space<vmem>>, vector<8x32xf32>
    %61 = arith.mulf %60, %3 : vector<8x32xf32>
    %cst_28 = arith.constant dense<0.000000e+00> : vector<8xf32>
    %62 = vector.multi_reduction <add>, %61, %cst_28 [1] : vector<8x32xf32> to vector<8xf32>
    %63 = vector.shape_cast %62 : vector<8xf32> to vector<8x1xf32>
    %cst_29 = arith.constant -1.000000e+01 : f32
    %cst_30 = arith.constant 1.000000e+01 : f32
    %64 = vector.broadcast %cst_29 : f32 to vector<8x1xf32>
    %65 = arith.maximumf %64, %63 : vector<8x1xf32>
    %66 = vector.broadcast %cst_30 : f32 to vector<8x1xf32>
    %67 = arith.minimumf %66, %65 : vector<8x1xf32>
    %68 = math.exp %67 : vector<8x1xf32>
    %69 = math.log1p %68 : vector<8x1xf32>
    %70 = arith.addf %59, %69 : vector<8x1xf32>
    %71 = tpu.iota {dimensions = array<i32: 0>} : vector<8x1xi32>
    %72 = vector.broadcast %0 : i32 to vector<8x1xi32>
    %73 = arith.addi %72, %71 : vector<8x1xi32>
    %c13_i32 = arith.constant 13 : i32
    %74 = vector.broadcast %c13_i32 : i32 to vector<8x1xi32>
    %75 = arith.cmpi slt, %73, %74 : vector<8x1xi32>
    %cst_31 = arith.constant 0.000000e+00 : f32
    %76 = vector.broadcast %cst_31 : f32 to vector<8x1xf32>
    %77 = arith.select %75, %70, %76 : vector<8x1xi1>, vector<8x1xf32>
    %78 = vector.shape_cast %77 : vector<8x1xf32> to vector<1x8x1xf32>
    %cst_32 = arith.constant dense<0.000000e+00> : vector<1xf32>
    %79 = vector.multi_reduction <add>, %78, %cst_32 [1, 2] : vector<1x8x1xf32> to vector<1xf32>
    %80 = vector.shape_cast %79 : vector<1xf32> to vector<1x1x1xf32>
    %81 = vector.extract %80[0, 0, 0] : f32 from vector<1x1x1xf32>
    %82 = vector.broadcast %81 : f32 to vector<1x8x128xf32>
    %c0_33 = arith.constant 0 : index
    %c0_34 = arith.constant 0 : index
    %c0_35 = arith.constant 0 : index
    %83 = vector.load %arg6[%c0_33, %c0_34, %c0_35] : memref<1x8x128xf32, #tpu.memory_space<vmem>>, vector<1x8x128xf32>
    tpu.vector_store %arg6[%c0_33, %c0_34, %c0_35], %82 {strides = array<i32>} : memref<1x8x128xf32, #tpu.memory_space<vmem>>, vector<1x8x128xf32>,
    return
  }
  func.func @transform_2(%arg0: i32, %arg1: memref<16xi32, #tpu.memory_space<smem>>, %arg2: memref<16xi32, #tpu.memory_space<smem>>, %arg3: memref<80xi32, #tpu.memory_space<smem>>) -> (i32, i32, i32) {
    %c0_i32 = arith.constant 0 : i32
    %c0_i32_0 = arith.constant 0 : i32
    %c0_i32_1 = arith.constant 0 : i32
    return %arg0, %c0_i32, %c0_i32_0 : i32, i32, i32
  }
}

</mosaic_0001>

<bundles_post_ra>
// kernel: tpu_custom_call.1
= control target key start
LH: loop header
LB: loop body
LE: loop exit
PB: predicated region body
PF: predicated region fallthrough
CT: control target
= control target key end

     0   :  { %s1119_s0 = inlined_call_operand.vmem [shape: s32[16], index: 0, kind: input, shape index: {}]   ;;  %s1120_s3 = inlined_call_operand.vmem [shape: f32[64,32], index: 3, kind: input, shape index: {}]   ;;  %s1121_s4 = inlined_call_operand.vmem [shape: f32[64,32], index: 4, kind: input, shape index: {}]   ;;  %s1122_s5 = inlined_call_operand.hbm [shape: f32[2,8,128], index: 5, kind: output, shape index: {}]   ;;  %s1123_s1 = inlined_call_operand.vmem [shape: s32[16], index: 1, kind: input, shape index: {}]   ;;  %s1124_s2 = inlined_call_operand.vmem [shape: s32[80], index: 2, kind: input, shape index: {}]  }
   0x1   :  { %s10_s20 = sshll.u32 %s1119_s0, 4  ;;  %s14_s23 = sshll.u32 %s1123_s1, 4  ;;  %s11_s20 = int_to_ptr.vmem [resolvable:$true] %s10_s20  ;;  %s15_s23 = int_to_ptr.vmem [resolvable:$true] %s14_s23 }
   0x2   :  { %s819_s24 = scalar_lea.vmem %s11_s20, 16  ;;  %p824_p1 = scmp.lt.s32.totalorder %s11_s20, %s11_s20 }
   0x3   :  { %p820_p0 = scmp.ne.s32.totalorder %s11_s20, %s819_s24  ;;  %p825_p2 = scmp.lt.s32.totalorder %s819_s24, %s819_s24 }
   0x5   :  { %p826_p3 = por %p825_p2, %p824_p1 }
   0x7   :  { %p827_p4 = pnand %p826_p3, %p820_p0 }
   0x9   :  { %830 = shalt.err (!%p827_p4)  }
   0xa   :  { %s931_s25 = smov [#allocation7]   ;;  %s831_s26 = scalar_lea.vmem %s15_s23, 16 }
   0xb   :  { %13 = dma.vmem_to_smem %s11_s20, 16, %s931_s25, [#allocation6] }
   0xc   :  { %p832_p5 = scmp.ne.s32.totalorder %s15_s23, %s831_s26  ;;  %p836_p6 = scmp.lt.s32.totalorder %s15_s23, %s15_s23 }
   0xd   :  { %p837_p7 = scmp.lt.s32.totalorder %s831_s26, %s831_s26 }
   0xf   :  { %p838_p8 = por %p837_p7, %p836_p6 }
  0x11   :  { %p839_p9 = pnand %p838_p8, %p832_p5 }
  0x13   :  { %842 = shalt.err (!%p839_p9)  }
  0x14   :  { %s932_s0 = smov [#allocation8]   ;;  %s18_s28 = sshll.u32 %s1124_s2, 4  ;;  %s19_s28 = int_to_ptr.vmem [resolvable:$true] %s18_s28 }
  0x15   :  { %17 = dma.vmem_to_smem %s15_s23, 16, %s932_s0, [#allocation6] }
  0x16   :  { %s843_s29 = scalar_lea.vmem %s19_s28, 16  ;;  %p848_p11 = scmp.lt.s32.totalorder %s19_s28, %s19_s28 }
  0x17   :  { %p844_p10 = scmp.ne.s32.totalorder %s19_s28, %s843_s29  ;;  %p849_p12 = scmp.lt.s32.totalorder %s843_s29, %s843_s29 }
  0x19   :  { %p850_p13 = por %p849_p12, %p848_p11 }
  0x1b   :  { %p851_p0 = pnand %p850_p13, %p844_p10 }
  0x1d   :  { %854 = shalt.err (!%p851_p0)  }
  0x1e   :  { %s933_s30 = smov [#allocation9]  }
  0x1f   :  { %21 = dma.vmem_to_smem %s19_s28, 16, %s933_s30, [#allocation6] }
  0x20   :  { %903 = dma.done.wait [#allocation6], 48 }
  0x21   :  { %904 = vsyncadd [#allocation6], 4294967248 }
  0x22   :  { %23 = sfence }
  0x23   :  { %24 = vsyncpa [#allocation11], 0 }
  0x24   :  { %26 = vsyncpa [#allocation11 + $0x1], 0  ;;  %s974_s6 = smov 0   ;;  %s976_s7 = smov 0  }
  0x25   :  { %s978_s2 = smov 0  }
  0x26 LB: > { %s719_s8 = sadd.s32 4294967295, %s921_s2   ;;  %s991_s9 = sadd.s32 1, %s921_s2   ;;  %s921_s2 = sphi %s978_s2, %s1129_s2   ;;  %s917_s7 = sphi %s976_s7, %s1128_s7   ;;  %s913_s6 = sphi %s974_s6, %s1127_s6  }
  0x27   : > { %s35_s10 = ssub.s32 %s921_s2, %s991_s9  ;;  %s38_s11 = sadd.s32 1, %s917_s7 }
  0x28   : > { %p36_p1 = scmp.eq.s32.totalorder %s35_s10, 0  ;;  %p720_p2 = scmp.ne.s32.totalorder %s35_s10, 0 }
  0x29   : > { %p42_p3 = scmp.eq.s32.totalorder %s921_s2, 1  ;;  %p47_p4 = scmp.ne.s32.totalorder %s917_s7, %s913_s6 }
  0x2a   : > { %s1000_s12 = scalar_select %p36_p1, %s917_s7, %s38_s11  }
  0x2b   : > { %p1002_p5 = por %p720_p2, %p42_p3  ;;  %p48_p6 = scmp.eq.s32.totalorder %s719_s8, 1 }
  0x2c   : > { %p721_p8 = scmp.ge.s32.totalorder %s921_s2, 2 }
  0x2d   : > { %p1006_p7 = por %p48_p6, %p47_p4  ;;  %s62_s15 = sand.u32 (!%p721_p8), 1, %s917_s7  }
  0x2e   : > { %57 = sbr.rel (%p721_p8) target bundleno = 547 (0x223), region = 12  ;;  %s723_s16 = sshll.u32 (!%p721_p8), %s921_s2, 3 }
  0x2f   : > { %s1015_s17 = sshll.u32 (!%p721_p8), %s62_s15, 3  ;;  %s1018_s19 = smov (!%p721_p8), 0  }
  0x30   : > { %s64_s18 = scalar_lea.vmem (!%p721_p8), [#allocation10], %s1015_s17 }
  0x35 LB: >> { %s1026_s20 = sadd.s32 %s925_s19, %s723_s16  ;;  %s75_s25 = scalar_lea.vmem [#allocation2], %s925_s19  ;;  %s925_s19 = sphi %s1018_s19, %s71_s19  }
  0x36   : >> { %s73_s21 = sld [smem:[#allocation7 + %s1026_s20]] }
  0x3c   : >> { %s74_s24 = scalar_lea.vmem %s1120_s3, %s73_s21 }
  0x3d   : >> { %v93_v0 = vld [vmem:[%s74_s24] sm:$0x1] }
  0x3e   : >> { %94 = vst [vmem:[%s75_s25] sm:$0x1] %v93_v0 }
  0x3f   : >> { %119 = vsyncadd [#allocation5], 16  ;;  %s120_s26 = sld [smem:[#allocation8 + %s1026_s20]]  ;;  %s122_s28 = scalar_lea.vmem [#allocation3], %s925_s19 }
  0x45   : >> { %s121_s27 = scalar_lea.vmem %s1121_s4, %s120_s26 }
  0x46   : >> { %v140_v1 = vld [vmem:[%s121_s27] sm:$0x1] }
  0x47   : >> { %141 = vst [vmem:[%s122_s28] sm:$0x1] %v140_v1 }
  0x48   : >> { %166 = vsyncadd [#allocation5], 16  ;;  %s167_s29 = sld [smem:[#allocation9 + %s1026_s20]]  ;;  %s169_s11 = scalar_lea.vmem [#allocation4], %s925_s19 }
  0x4e   : >> { %s168_s10 = scalar_lea.vmem %s1121_s4, %s167_s29 }
  0x4f   : >> { %v187_v2 = vld [vmem:[%s168_s10] sm:$0x1] }
  0x50   : >> { %188 = vst [vmem:[%s169_s11] sm:$0x1] %v187_v2 }
  0x51   : >> { %213 = vsyncadd [#allocation5], 16  ;;  %s214_s21 = sadd.s32 16, %s1026_s20 }
  0x52   : >> { %s215_s22 = sld [smem:[#allocation9 + %s214_s21]] }
  0x58   : >> { %s217_s25 = scalar_lea.vmem %s1121_s4, %s215_s22 }
  0x59   : >> { %v236_v3 = vld [vmem:[%s217_s25] sm:$0x1] }
  0x5a   : >> { %725 = vst [vmem:[%s169_s11 + $0x8] sm:$0x1] %v236_v3 }
  0x5b   : >> { %262 = vsyncadd [#allocation5], 16  ;;  %s263_s26 = sadd.s32 32, %s1026_s20 }
  0x5c   : >> { %s264_s0 = sld [smem:[#allocation9 + %s263_s26]] }
  0x62   : >> { %s266_s28 = scalar_lea.vmem %s1121_s4, %s264_s0 }
  0x63   : >> { %v285_v4 = vld [vmem:[%s266_s28] sm:$0x1] }
  0x64   : >> { %727 = vst [vmem:[%s169_s11 + $0x10] sm:$0x1] %v285_v4 }
  0x65   : >> { %311 = vsyncadd [#allocation5], 16  ;;  %s312_s29 = sadd.s32 48, %s1026_s20 }
  0x66   : >> { %s313_s30 = sld [smem:[#allocation9 + %s312_s29]] }
  0x6c   : >> { %s315_s21 = scalar_lea.vmem %s1121_s4, %s313_s30 }
  0x6d   : >> { %v334_v5 = vld [vmem:[%s315_s21] sm:$0x1] }
  0x6e   : >> { %729 = vst [vmem:[%s169_s11 + $0x18] sm:$0x1] %v334_v5 }
  0x6f   : >> { %360 = vsyncadd [#allocation5], 16  ;;  %s361_s22 = sadd.s32 64, %s1026_s20 }
  0x70   : >> { %s362_s23 = sld [smem:[#allocation9 + %s361_s22]] }
  0x76   : >> { %s364_s26 = scalar_lea.vmem %s1121_s4, %s362_s23 }
  0x77   : >> { %v383_v6 = vld [vmem:[%s364_s26] sm:$0x1] }
  0x78   : >> { %731 = vst [vmem:[%s169_s11 + $0x20] sm:$0x1] %v383_v6 }
  0x79   : >> { %409 = vsyncadd [#allocation5], 16  ;;  %s71_s19 = sadd.s32 1, %s925_s19  }
  0x7a   : >> { %p68_p9 = scmp.ge.s32.totalorder %s71_s19, 8  }
  0x7b   : > { %s927_s0 = smov (%p68_p9), 0  }
  0x7c   : > { %70 = sbr.rel (!%p68_p9) target bundleno = 53 (0x35), region = 352 }
  0x83 LB: >> { %905 = dma.done.wait [#allocation5], 16  ;;  %s929_s0 = sphi %s927_s0, %s415_s0  }
  0x84   : >> { %906 = vsyncadd [#allocation5], 4294967280  ;;  %s415_s0 = sadd.s32 1, %s929_s0  }
  0x85   : >> { %p412_p10 = scmp.ge.s32.totalorder %s415_s0, 56  }
  0x86   : > { %v419_v7 = vld [vmem:[#allocation2] sm:$0xff] (%p412_p10)  ;;  %vm422_vm0 = vcmask (%p412_p10), 261120   ;;  %v459_v8 = vld [vmem:[#allocation4 + $0x8] sm:$0xff] (%p412_p10)  ;;  %v420_v9 = vld [vmem:[#allocation3] sm:$0xff] (%p412_p10)  ;;  %v535_v62 = vlaneseq (%p412_p10)  ;;  %vm541_vm8 = vcmask (%p412_p10), 7168   ;;  %s568_s19 = sshll.u32 (%p412_p10), %s64_s18, 4  ;;  %s1078_s19 = int_to_ptr.vmem [resolvable:$true] %s568_s19 }
  0x87   : > { %414 = sbr.rel (!%p412_p10) target bundleno = 131 (0x83), region = 363  ;;  %v460_v10 = vmul.f32 (%p412_p10), %v459_v8, %v419_v7  ;;  %v421_v11 = vmul.f32 (%p412_p10), %v420_v9, %v419_v7  ;;  %v478_v12 = vld [vmem:[#allocation4 + $0x10] sm:$0xff] (%p412_p10)  ;;  %v440_v13 = vld [vmem:[#allocation4] sm:$0xff] (%p412_p10)  ;;  %v497_v17 = vld [vmem:[#allocation4 + $0x18] sm:$0xff] (%p412_p10)  ;;  %s555_s28 = scalar_lea.sflag (%p412_p10), [#allocation11], %s62_s15 }
  0x88   : > { %v479_v14 = vmul.f32 (%p412_p10), %v478_v12, %v419_v7  ;;  %v441_v15 = vmul.f32 (%p412_p10), %v440_v13, %v419_v7  ;;  %v516_v16 = vld [vmem:[#allocation4 + $0x20] sm:$0xff] (%p412_p10)  ;;  %v498_v23 = vmul.f32 (%p412_p10), %v497_v17, %v419_v7  ;;  %v536_v12 = vshrl.u32 (%p412_p10), %v535_v62, 7  ;;  %s855_s29 = scalar_lea.vmem (%p412_p10), %s1078_s19, 128  ;;  %s934_s30 = smov (%p412_p10), [#allocation10]  }
  0x89   : > { %v461_v18 = vsel (%p412_p10), %vm422_vm0, %v460_v10, 0.0  ;;  %v423_v19 = vsel (%p412_p10), %vm422_vm0, %v421_v11, 0.0  ;;  %v517_v22 = vmul.f32 (%p412_p10), %v516_v16, %v419_v7  ;;  %p856_p11 = scmp.ne.s32.totalorder (%p412_p10), %s1078_s19, %s855_s29  ;;  %s859_s8 = sshll.u32 (%p412_p10), %s934_s30, 4  ;;  %s860_s8 = int_to_ptr.vmem [resolvable:$false] %s859_s8 }
  0x8a   : > { %462 = vadd.xlane.f32.xlu1 (%p412_p10), %v461_v18  ;;  %424 = vadd.xlane.f32.xlu0 (%p412_p10), %v423_v19  ;;  %v480_v20 = vsel (%p412_p10), %vm422_vm0, %v479_v14, 0.0  ;;  %v442_v21 = vsel (%p412_p10), %vm422_vm0, %v441_v15, 0.0  ;;  %v499_v25 = vsel (%p412_p10), %vm422_vm0, %v498_v23, 0.0  ;;  %s861_s10 = scalar_lea.vmem (%p412_p10), %s860_s8, 256  ;;  %p862_p0 = scmp.lt.s32.totalorder (%p412_p10), %s1078_s19, %s860_s8 }
  0x8b   : > { %v518_v24 = vsel (%p412_p10), %vm422_vm0, %v517_v22, 0.0  ;;  %p857_p12 = pnand (%p412_p10), %p856_p11, %p1002_p5  ;;  %p863_p1 = scmp.lt.s32.totalorder (%p412_p10), %s861_s10, %s855_s29 }
  0x8d   : > { %p858_p13 = pneg (%p412_p10), %p857_p12  ;;  %p864_p2 = por (%p412_p10), %p863_p1, %p862_p0 }
  0x8e   : > { %481 = vadd.xlane.f32.xlu1 %v480_v20  ;;  %443 = vadd.xlane.f32.xlu0 %v442_v21 }
  0x8f   : > { %p865_p3 = pnand %p864_p2, %p858_p13 }
  0x92   : > { %519 = vadd.xlane.f32.xlu1 %v518_v24  ;;  %500 = vadd.xlane.f32.xlu0 %v499_v25 }
 0x117   : > { %v463_v26 = vpop.xlane.xlu1 %462  ;;  %v425_v27 = vpop.xlane.xlu0 %424 }
 0x118   : > { %v734_v28 = vclamps-f32 %v463_v26, 10.0  ;;  %v732_v29 = vclamps-f32 %v425_v27, 10.0  ;;  %v537_v27 = vstv %s723_s16  ;;  %s739_s16 = sshll.u32 %s921_s2, 7 }
 0x119   : > { %s1076_s1 = scalar_lea.hbm %s1122_s5, %s739_s16 }
 0x11a   : > { %v466_v30 = vmul.f32 1.442695, %v734_v28  ;;  %v428_v31 = vsub.f32 0.0, %v732_v29 }
 0x11b   : > { %v482_v32 = vpop.xlane.xlu1 %481  ;;  %v444_v33 = vpop.xlane.xlu0 %443 }
 0x11c   : > { %795 = vpow2.f32 %v466_v30  ;;  %v429_v34 = vmul.f32 1.442695, %v428_v31  ;;  %v735_v35 = vclamps-f32 %v482_v32, 10.0  ;;  %v733_v36 = vclamps-f32 %v444_v33, 10.0 }
 0x11e   : > { %797 = vpow2.f32 %v429_v34  ;;  %v485_v37 = vmul.f32 1.442695, %v735_v35  ;;  %v447_v38 = vmul.f32 1.442695, %v733_v36 }
 0x11f   : > { %v520_v39 = vpop.xlane.xlu1 %519  ;;  %v501_v40 = vpop.xlane.xlu0 %500 }
 0x120   : > { %799 = vpow2.f32 %v485_v37  ;;  %v737_v41 = vclamps-f32 %v520_v39, 10.0  ;;  %v736_v42 = vclamps-f32 %v501_v40, 10.0  ;;  %v538_v37 = vadd.s32 %v537_v27, %v536_v12 }
 0x121   : > { %801 = vpow2.f32 %v447_v38 }
 0x122   : > { %v523_v43 = vmul.f32 1.442695, %v737_v41  ;;  %v504_v44 = vmul.f32 1.442695, %v736_v42  ;;  %vm539_vm7 = vcmp.lt.s32.totalorder %v538_v37, 13 }
 0x124   : > { %803 = vpow2.f32 %v523_v43 }
 0x125   : > { %805 = vpow2.f32 %v504_v44 }
 0x126   : > { %v796_v45 = vpop.eup %795 }
 0x127   : > { %v468_v47 = vadd.f32 1.0, %v796_v45  ;;  %v471_v59 = vmul.f32 -0.5, %v796_v45  ;;  %v474_v10 = vand.u32 2147483647, %v796_v45 }
 0x128   : > { %v798_v46 = vpop.eup %797 }
 0x129   : > { %v431_v48 = vadd.f32 1.0, %v798_v46  ;;  %v434_v56 = vmul.f32 -0.5, %v798_v46  ;;  %v437_v2 = vand.u32 2147483647, %v798_v46  ;;  %v472_v4 = vadd.f32 1.0, %v471_v59 }
 0x12a   : > { %v800_v49 = vpop.eup %799  ;;  %vm475_vm3 = vcmp.lt.f32.partialorder %v474_v10, 0.0004427343 }
 0x12b   : > { %v802_v50 = vpop.eup %801  ;;  %807 = vlog2.f32 %v431_v48  ;;  %v487_v51 = vadd.f32 1.0, %v800_v49  ;;  %v435_v60 = vadd.f32 1.0, %v434_v56  ;;  %v490_v61 = vmul.f32 -0.5, %v800_v49 }
 0x12c   : > { %v449_v52 = vadd.f32 1.0, %v802_v50  ;;  %809 = vlog2.f32 %v468_v47  ;;  %v452_v58 = vmul.f32 -0.5, %v802_v50  ;;  %v455_v3 = vand.u32 2147483647, %v802_v50 }
 0x12d   : > { %811 = vlog2.f32 %v487_v51  ;;  %v436_v9 = vmul.f32 %v798_v46, %v435_v60  ;;  %v491_v11 = vadd.f32 1.0, %v490_v61  ;;  %vm438_vm1 = vcmp.lt.f32.partialorder %v437_v2, 0.0004427343 }
 0x12e   : > { %v804_v53 = vpop.eup %803  ;;  %813 = vlog2.f32 %v449_v52  ;;  %v453_v0 = vadd.f32 1.0, %v452_v58  ;;  %vm456_vm2 = vcmp.lt.f32.partialorder %v455_v3, 0.0004427343  ;;  %v473_v17 = vmul.f32 %v796_v45, %v472_v4 }
 0x12f   : > { %v806_v54 = vpop.eup %805  ;;  %v525_v55 = vadd.f32 1.0, %v804_v53  ;;  %v528_v16 = vmul.f32 -0.5, %v804_v53  ;;  %v493_v18 = vand.u32 2147483647, %v800_v49  ;;  %v492_v29 = vmul.f32 %v800_v49, %v491_v11 }
 0x130   : > { %v506_v57 = vadd.f32 1.0, %v806_v54  ;;  %v509_v7 = vmul.f32 -0.5, %v806_v54  ;;  %v454_v14 = vmul.f32 %v802_v50, %v453_v0  ;;  %v512_v26 = vand.u32 2147483647, %v806_v54 }
 0x131   : > { %815 = vlog2.f32 %v525_v55  ;;  %v529_v31 = vadd.f32 1.0, %v528_v16  ;;  %vm494_vm4 = vcmp.lt.f32.partialorder %v493_v18, 0.0004427343  ;;  %v531_v33 = vand.u32 2147483647, %v804_v53 }
 0x132   : > { %817 = vlog2.f32 %v506_v57  ;;  %v510_v23 = vadd.f32 1.0, %v509_v7  ;;  %vm513_vm5 = vcmp.lt.f32.partialorder %v512_v26, 0.0004427343 }
 0x133   : > { %v530_v40 = vmul.f32 %v804_v53, %v529_v31  ;;  %vm532_vm6 = vcmp.lt.f32.partialorder %v531_v33, 0.0004427343 }
 0x134   : > { %v511_v35 = vmul.f32 %v806_v54, %v510_v23 }
 0x135   : > { %v808_v63 = vpop.eup %807 }
 0x136   : > { %v810_v1 = vpop.eup %809  ;;  %v433_v6 = vmul.f32 0.6931472, %v808_v63 }
 0x137   : > { %v812_v5 = vpop.eup %811  ;;  %v470_v15 = vmul.f32 0.6931472, %v810_v1 }
 0x138   : > { %v814_v8 = vpop.eup %813  ;;  %v439_v20 = vsel %vm438_vm1, %v436_v9, %v433_v6  ;;  %v489_v22 = vmul.f32 0.6931472, %v812_v5 }
 0x139   : > { %v451_v13 = vmul.f32 0.6931472, %v814_v8  ;;  %v476_v28 = vsel %vm475_vm3, %v473_v17, %v470_v15 }
 0x13a   : > { %v495_v34 = vsel %vm494_vm4, %v492_v29, %v489_v22 }
 0x13b   : > { %v816_v19 = vpop.eup %815  ;;  %v457_v21 = vsel %vm456_vm2, %v454_v14, %v451_v13 }
 0x13c   : > { %v818_v24 = vpop.eup %817  ;;  %v458_v25 = vadd.f32 %v457_v21, %v439_v20  ;;  %v527_v36 = vmul.f32 0.6931472, %v816_v19 }
 0x13d   : > { %v508_v30 = vmul.f32 0.6931472, %v818_v24 }
 0x13e   : > { %v477_v32 = vadd.f32 %v476_v28, %v458_v25  ;;  %v533_v42 = vsel %vm532_vm6, %v530_v40, %v527_v36 }
 0x13f   : > { %v514_v39 = vsel %vm513_vm5, %v511_v35, %v508_v30 }
 0x140   : > { %v496_v38 = vadd.f32 %v495_v34, %v477_v32 }
 0x142   : > { %v515_v41 = vadd.f32 %v514_v39, %v496_v38 }
 0x144   : > { %v534_v43 = vadd.f32 %v533_v42, %v515_v41 }
 0x146   : > { %v540_v44 = vsel %vm539_vm7, %v534_v43, 0.0 }
 0x147   : > { %v542_v45 = vsel %vm541_vm8, %v540_v44, 0.0 }
 0x148   : > { %543 = vadd.xlane.f32.xlu0 %v542_v45 }
 0x1d5   : > { %v544_v46 = vpop.xlane.xlu0 %543 }
 0x1d6   : > { %v545_v47 = vrot.slane %v544_v46, 4 }
 0x1d8   : > { %v546_v48 = vadd.f32 %v545_v47, %v544_v46 }
 0x1da   : > { %v547_v49 = vrot.slane %v546_v48, 2 }
 0x1dc   : > { %v548_v50 = vadd.f32 %v547_v49, %v546_v48 }
 0x1de   : > { %v549_v51 = vrot.slane %v548_v50, 1 }
 0x1e0   : > { %v550_v52 = vadd.f32 %v549_v51, %v548_v50 }
 0x1e2   : > { %743 = vpush %v550_v52 }
 0x213   : > { %s744_s27 = spop %743 }
 0x214   : > { %v552_v53 = vstv %s744_s27 }
 0x215   : > { %553 = vst [vmem:[%s64_s18] sm:$0xff] %v552_v53 }
 0x216   : > { %868 = shalt.err (!%p865_p3)
}
 0x217   : > { %s869_s15 = scalar_lea.hbm %s1076_s1, 128  ;;  %s873_s21 = scalar_lea.hbm %s1122_s5, 256 }
 0x218   : > { %p870_p4 = scmp.ne.s32.totalorder %s1076_s1, %s869_s15  ;;  %p874_p9 = scmp.lt.u32.totalorder %s1076_s1, %s1122_s5 }
 0x219   : > { %p875_p10 = scmp.lt.u32.totalorder %s873_s21, %s869_s15  ;;  %p877_p12 = scmp.lt.u32.totalorder %s869_s15, %s1076_s1 }
 0x21a   : > { %p871_p6 = pnand %p870_p4, %p1002_p5 }
 0x21b   : > { %p876_p11 = por %p875_p10, %p874_p9 }
 0x21c   : > { %p872_p8 = pneg %p871_p6 }
 0x21d   : > { %p878_p13 = por %p877_p12, %p876_p11 }
 0x21f   : > { %p879_p0 = pnand %p878_p13, %p872_p8 }
 0x221   : > { %882 = shalt.err (!%p879_p0)
}
 0x222   : > { %745 = dma.vmem_to_hbm [thread:$0]  (%p1002_p5), %s1078_s19, 128, %s1076_s1, %s555_s28  }
 0x223 PF: > { %p751_p1 = scmp.ge.s32.totalorder %s921_s2, 1  ;;  %s580_s24 = sand.u32 1, %s913_s6  }
 0x224   : > { %s581_s25 = scalar_lea.sflag [#allocation11], %s580_s24 }
 0x225   : > { %p748_p2 = pnand %p751_p1, %p1006_p7 }
 0x227   : > { %908 = dma.done.wait (!%p748_p2), %s581_s25, 128  }
 0x228   : > { %910 = vsyncadd (!%p748_p2), %s581_s25, 4294967168  ;;  %p29_p3 = scmp.ge.s32.totalorder %s991_s9, 3   ;;  %s1127_s6 = smov %s917_s7 }
 0x229   : > { %s1128_s7 = smov %s1000_s12  ;;  %s1129_s2 = smov %s991_s9 }
 0x22a   :  { %31 = sbr.rel (!%p29_p3) target bundleno = 38 (0x26), region = 374 }
 0x231   :  { %586 = vsyncpa [#allocation11], 1 }
 0x232   :  { %588 = vsyncpa [#allocation11 + $0x1], 1 }
 0x233   :  { %589 = vsyncmov [#allocation5] }
 0x236   :  { %s590_s2 = vpop.sfrf %589 }
 0x237   :  { %p742_p5 = scmp.ne.s32.totalorder %s590_s2, 0 }
 0x239   :  { %594 = shalt.err (%p742_p5)  }

</bundles_post_ra>
